<compile_context>
chip_gen: v7x
topology: tpu7x:2x2x1
jax: 0.10.0
libtpu: 0.0.40
codegen_flags: <defaults>
</compile_context>

<pallas_src>
import jax
import jax.numpy as jnp
from jax.experimental import pallas as pl
from jax.experimental.pallas import tpu as pltpu


def _scale_kernel(scale_ref, x_ref, o_ref):
    # scale_ref: (1,) fp32 parameter in SMEM
    # x_ref / o_ref: (TR, W) lane-dense VMEM tiles (W multiple of 128)
    o_ref[...] = (x_ref[...].astype(jnp.float32) * scale_ref[0]).astype(o_ref.dtype)


def _round_up(a, b):
    return ((a + b - 1) // b) * b


def scale_forward(x, scale, *, target_block_bytes=4 * 1024 * 1024,
                  min_pallas_elems=2048):
    """Elementwise `x * scale` where `scale` is a 1-element fp32 parameter."""
    out_dtype = jnp.promote_types(x.dtype, scale.dtype)
    n = x.size

    # Fast path: tiny tensors (launch overhead dominates; let XLA fuse) or
    # tensors without a clean (rows, k*128) view (avoid full-array pad/slice).
    if n == 0 or n < min_pallas_elems or n % 128 != 0:
        return (x * scale[0]).astype(out_dtype)

    in_itemsize = jnp.dtype(x.dtype).itemsize
    out_itemsize = jnp.dtype(out_dtype).itemsize
    # dtype-aware minimum sublane tile: 8 (4-byte), 16 (2-byte), 32 (1-byte)
    min_sub = 32 // min(in_itemsize, out_itemsize)

    # Widest lane dimension that divides n exactly (no padding needed).
    W = 128
    for cand in (1024, 512, 256):
        if n % cand == 0 and (n // cand) >= min_sub:
            W = cand
            break
    rows = n // W

    if rows < min_sub:
        # Block equals the full array in the sublane dim (legal per the
        # (8,128)-or-full-dim rule).
        tr = rows
    else:
        bytes_per_row = W * max(in_itemsize, out_itemsize)
        tr = max(min_sub,
                 (target_block_bytes // bytes_per_row) // min_sub * min_sub)
        tr = min(tr, (rows // min_sub) * min_sub)
        # Give the megacore (v7x: 2 TCs) at least 2 parallel blocks when
        # there is enough work for it.
        if pl.cdiv(rows, tr) == 1 and rows >= 2 * min_sub:
            tr = _round_up(pl.cdiv(rows, 2), min_sub)

    grid = (pl.cdiv(rows, tr),)
    x2d = x.reshape(rows, W)

    out2d = pl.pallas_call(
        _scale_kernel,
        out_shape=jax.ShapeDtypeStruct((rows, W), out_dtype),
        grid_spec=pltpu.PrefetchScalarGridSpec(
            num_scalar_prefetch=0,
            grid=grid,
            in_specs=[
                pl.BlockSpec(memory_space=pltpu.MemorySpace.SMEM),  # scale
                pl.BlockSpec((tr, W), lambda i: (i, 0)),            # x tile
            ],
            out_specs=pl.BlockSpec((tr, W), lambda i: (i, 0)),
        ),
        compiler_params=pltpu.CompilerParams(
            dimension_semantics=("parallel",)),
    )(scale.astype(jnp.float32), x2d)

    return out2d.reshape(x.shape)


class ScalePallas:
    """JAX/Pallas equivalent of pysot Scale(nn.Module)."""

    def __init__(self, init_value=1.0):
        # nn.Parameter(torch.FloatTensor([init_value])) -> shape (1,), float32
        self.scale = jnp.array([init_value], dtype=jnp.float32)

    def __call__(self, x):
        return scale_forward(x, self.scale)


if __name__ == "__main__":
    key = jax.random.PRNGKey(0)
    k1, k2, k3 = jax.random.split(key, 3)

    module = ScalePallas(init_value=1.5)

    # 1) small NCHW feature map consistent with the module -> Pallas path,
    #    single (8, 256) block.
    x = jax.random.normal(k1, (2, 4, 16, 16), dtype=jnp.float32)
    out = jax.block_until_ready(module(x))
    ref = x * module.scale[0]
    assert out.shape == x.shape and out.dtype == ref.dtype
    assert jnp.allclose(out, ref, atol=1e-6, rtol=1e-6)

    # 2) bigger map: wide (1024) lanes, 2 grid blocks with a masked partial
    #    tail (36 rows, tile 32) -> exercises multi-step parallel pipeline.
    x2 = jax.random.normal(k2, (2, 32, 24, 24), dtype=jnp.float32)
    out2 = jax.block_until_ready(module(x2))
    ref2 = x2 * module.scale[0]
    assert out2.shape == x2.shape and out2.dtype == ref2.dtype
    assert jnp.allclose(out2, ref2, atol=1e-6, rtol=1e-6)

    # 3) awkward size (not a multiple of 128): plain-XLA fast path.
    x3 = jax.random.normal(k3, (2, 4, 15, 15), dtype=jnp.float32)
    out3 = jax.block_until_ready(module(x3))
    ref3 = x3 * module.scale[0]
    assert out3.shape == x3.shape and out3.dtype == ref3.dtype
    assert jnp.allclose(out3, ref3, atol=1e-6, rtol=1e-6)

    print("KERNEL_OK")
</pallas_src>

<mosaic_0001>
module attributes {stable_mosaic.version = 11 : i64} {
  func.func @_scale_kernel(%arg0: i32, %arg1: memref<1xf32, #tpu.memory_space<smem>>, %arg2: memref<8x256xf32, #tpu.memory_space<vmem>>, %arg3: memref<8x256xf32, #tpu.memory_space<vmem>>) attributes {dimension_semantics = [#tpu.dimension_semantics<parallel>], iteration_bounds = array<i64: 1>, scalar_prefetch = 0 : i64, scratch_operands = 0 : i64, tpu.core_type = #tpu.core_type<tc>, window_params = [{transform_indices = @transform_0, window_bounds = array<i64: 1>}, {transform_indices = @transform_1, window_bounds = array<i64: 8, 256>}, {transform_indices = @transform_2, window_bounds = array<i64: 8, 256>}]} {
    %c0 = arith.constant 0 : index
    %c0_0 = arith.constant 0 : index
    %0 = vector.load %arg2[%c0, %c0_0] : memref<8x256xf32, #tpu.memory_space<vmem>>, vector<8x256xf32>
    %c0_1 = arith.constant 0 : index
    %1 = memref.load %arg1[%c0_1] : memref<1xf32, #tpu.memory_space<smem>>
    %2 = vector.broadcast %1 : f32 to vector<8x256xf32>
    %3 = arith.mulf %0, %2 : vector<8x256xf32>
    %c0_2 = arith.constant 0 : index
    %c0_3 = arith.constant 0 : index
    %4 = vector.load %arg3[%c0_2, %c0_3] : memref<8x256xf32, #tpu.memory_space<vmem>>, vector<8x256xf32>
    tpu.vector_store %arg3[%c0_2, %c0_3], %3 {strides = array<i32>} : memref<8x256xf32, #tpu.memory_space<vmem>>, vector<8x256xf32>,
    return
  }
  func.func @transform_0(%arg0: i32) -> i32 {
    %c0_i32 = arith.constant 0 : i32
    %c0_i32_0 = arith.constant 0 : i32
    return %c0_i32 : i32
  }
  func.func @transform_1(%arg0: i32) -> (i32, i32) {
    %c0_i32 = arith.constant 0 : i32
    %c0_i32_0 = arith.constant 0 : i32
    return %arg0, %c0_i32 : i32, i32
  }
  func.func @transform_2(%arg0: i32) -> (i32, i32) {
    %c0_i32 = arith.constant 0 : i32
    %c0_i32_0 = arith.constant 0 : i32
    return %arg0, %c0_i32 : i32, i32
  }
}

</mosaic_0001>

<bundles_post_ra>
// kernel: tpu_custom_call.1
= control target key start
LH: loop header
LB: loop body
LE: loop exit
PB: predicated region body
PF: predicated region fallthrough
CT: control target
= control target key end

     0   :  { %8 = vsyncpa [#allocation4], 0  ;;  %s142_s0 = inlined_call_operand.<no memory space> [shape: f32[1], index: 0, kind: input, shape index: {}]   ;;  %s143_s1 = inlined_call_operand.hbm [shape: f32[8,256], index: 1, kind: input, shape index: {}]   ;;  %s144_s2 = inlined_call_operand.hbm [shape: f32[8,256], index: 2, kind: output, shape index: {}]  }
   0x1   :  { %9 = vsyncpa [#allocation5], 0  ;;  %s98_s9 = smov [#allocation3]   ;;  %s50_s13 = scalar_lea.hbm %s143_s1, 256 }
   0x2   :  { %s18_s10 = sshll.u32 %s98_s9, 4  ;;  %p51_p0 = scmp.ne.s32.totalorder %s143_s1, %s50_s13  ;;  %s19_s10 = int_to_ptr.vmem [resolvable:$true] %s18_s10 }
   0x3   :  { %p54_p1 = scmp.lt.u32.totalorder %s50_s13, %s143_s1 }
   0x5   :  { %p56_p2 = pnand %p54_p1, %p51_p0 }
   0x7   :  { %59 = shalt.err (!%p56_p2)
}
   0x8   :  { %s60_s18 = scalar_lea.vmem %s19_s10, 256  ;;  %p65_p4 = scmp.lt.s32.totalorder %s19_s10, %s19_s10 }
   0x9   :  { %p61_p3 = scmp.ne.s32.totalorder %s19_s10, %s60_s18  ;;  %p66_p5 = scmp.lt.s32.totalorder %s60_s18, %s60_s18 }
   0xb   :  { %p67_p6 = por %p66_p5, %p65_p4 }
   0xd   :  { %p68_p7 = pnand %p67_p6, %p61_p3 }
   0xf   :  { %71 = shalt.err (!%p68_p7)
}
  0x10   :  { %21 = dma.hbm_to_vmem [thread:$0]  %s143_s1, 256, %s19_s10, [#allocation4]  }
  0x11   :  { %94 = dma.done.wait [#allocation4], 256  }
  0x12   :  { %95 = vsyncadd [#allocation4], 4294967040  ;;  %v28_v0 = vstv %s142_s0  ;;  %s99_s23 = smov [#allocation6]   ;;  %v25_v1 = vld [vmem:[#allocation3] sm:$0xff]  ;;  %v26_v2 = vld [vmem:[#allocation3 + $0x8] sm:$0xff] }
  0x13   :  { %s39_s24 = sshll.u32 %s99_s23, 4  ;;  %v29_v3 = vmul.f32 %v28_v0, %v25_v1  ;;  %v30_v4 = vmul.f32 %v28_v0, %v26_v2  ;;  %s40_s24 = int_to_ptr.vmem [resolvable:$true] %s39_s24 }
  0x14   :  { %s72_s25 = scalar_lea.vmem %s40_s24, 256  ;;  %p77_p9 = scmp.lt.s32.totalorder %s40_s24, %s40_s24 }
  0x15   :  { %31 = vst [vmem:[#allocation6] sm:$0xff] %v29_v3  ;;  %32 = vst [vmem:[#allocation6 + $0x8] sm:$0xff] %v30_v4  ;;  %p73_p8 = scmp.ne.s32.totalorder %s40_s24, %s72_s25  ;;  %p78_p10 = scmp.lt.s32.totalorder %s72_s25, %s72_s25 }
  0x17   :  { %p79_p11 = por %p78_p10, %p77_p9 }
  0x19   :  { %p80_p12 = pnand %p79_p11, %p73_p8 }
  0x1b   :  { %83 = shalt.err (!%p80_p12)
}
  0x1c   :  { %s84_s0 = scalar_lea.hbm %s144_s2, 256 }
  0x1d   :  { %p85_p13 = scmp.ne.s32.totalorder %s144_s2, %s84_s0  ;;  %p88_p0 = scmp.lt.u32.totalorder %s84_s0, %s144_s2 }
  0x1f   :  { %p90_p1 = pnand %p88_p0, %p85_p13 }
  0x21   :  { %93 = shalt.err (!%p90_p1)
}
  0x22   :  { %42 = dma.vmem_to_hbm [thread:$0]  %s40_s24, 256, %s144_s2, [#allocation5]  }
  0x23   :  { %96 = dma.done.wait [#allocation5], 256  }
  0x24   :  { %97 = vsyncadd [#allocation5], 4294967040 }
  0x25   :  { %46 = vsyncpa [#allocation4], 1 }
  0x26   :  { %47 = vsyncpa [#allocation5], 1 }

</bundles_post_ra>
